<compile_context>
chip_gen: v6e
topology: v6e:2x2x1
jax: 0.10.0
libtpu: 0.0.40
codegen_flags: <defaults>
</compile_context>

<pallas_src>
import jax
import jax.numpy as jnp
import numpy as np
from jax.experimental import pallas as pl
from jax.experimental.pallas import tpu as pltpu


# --------------------------------------------------------------------------
# Kernel A: FC head  sigmoid(Linear2(relu6(Linear1(pooled))))
#   Tiny tensors -> single launch, fully fused, lane-dense padded output.
# --------------------------------------------------------------------------
def fc_kernel(feat_ref, w1_ref, b1_ref, w2_ref, o_ref):
    h = jnp.dot(feat_ref[...], w1_ref[...],
                preferred_element_type=jnp.float32) + b1_ref[...]
    h = jnp.clip(h, 0.0, 6.0)                               # ReLU6
    p = jnp.dot(h, w2_ref[...], preferred_element_type=jnp.float32)
    o_ref[...] = jax.nn.sigmoid(p)


# --------------------------------------------------------------------------
# Kernel B (hot path): per-(batch, spatial-tile) transform
#   out[c] = ((sum_j M[b,c,j] * x[j]) + add[b,c]) ** gamma[b,c]
#   out[c] = (out[c] - mean[c]) * inv_std[c]
# Params are scalars in SMEM (indexed by program_id); image blocks are
# (1, C, 8, TILE_S) f32 in VMEM, auto double-buffered by BlockSpec.
# --------------------------------------------------------------------------
def transform_kernel(mix_ref, add_ref, gamma_ref, mean_ref, istd_ref,
                     x_ref, o_ref):
    b = pl.program_id(0)
    c = x_ref.shape[1]
    for i in range(c):                                # static unroll (C == 3)
        acc = mix_ref[b, i * c] * x_ref[0, 0]         # VPU broadcast FMAs
        for j in range(1, c):
            acc = acc + mix_ref[b, i * c + j] * x_ref[0, j]
        acc = acc + add_ref[b, i]
        # fractional power; base > 0 by module construction (sigmoid-weighted
        # mix of a positive image plus a positive bias).
        acc = jnp.exp(gamma_ref[b, i] * jnp.log(acc))
        o_ref[0, i] = ((acc - mean_ref[0, i]) * istd_ref[0, i]).astype(o_ref.dtype)


def _choose_spatial_tile(s, max_tile=1024):
    """Largest multiple-of-128 divisor of s that is <= max_tile, else s."""
    if s <= max_tile:
        return s
    for t in range(max_tile, 0, -128):
        if s % t == 0:
            return t
    return s   # odd shapes: fall back to a single block along S


# --------------------------------------------------------------------------
# Wrapper
# --------------------------------------------------------------------------
def preprocessing_forward(x, w1, b1, w2, mean, std, pool_size):
    b, c, h, w = x.shape
    assert c == 3, "module semantics require input_channels == 3 (view(b,3,3))"
    assert h % pool_size == 0 and w % pool_size == 0
    hw = h * w
    hidden = w1.shape[1]
    n_param = c * c + 2 * c

    xf = x.astype(jnp.float32)

    # ---- adaptive average pool (plain JAX; no dense pooling matrix) -------
    hb, wb = h // pool_size, w // pool_size
    pooled = xf.reshape(b, c, pool_size, hb, pool_size, wb).mean(axis=(3, 5))
    feat = pooled.reshape(b, c * pool_size * pool_size)
    in_f = feat.shape[1]

    # ---- FC head: single fused Pallas launch, lane-dense padded output ----
    n_pad = ((n_param + 127) // 128) * 128
    w2p = jnp.pad(w2.astype(jnp.float32), ((0, 0), (0, n_pad - n_param)))
    param_pad = pl.pallas_call(
        fc_kernel,
        out_shape=jax.ShapeDtypeStruct((b, n_pad), jnp.float32),
        grid=(1,),
        in_specs=[pl.BlockSpec((b, in_f), lambda i: (0, 0)),
                  pl.BlockSpec((in_f, hidden), lambda i: (0, 0)),
                  pl.BlockSpec((1, hidden), lambda i: (0, 0)),
                  pl.BlockSpec((hidden, n_pad), lambda i: (0, 0))],
        out_specs=pl.BlockSpec((b, n_pad), lambda i: (0, 0)),
        compiler_params=pltpu.CompilerParams(
            dimension_semantics=("arbitrary",)),
    )(feat, w1.astype(jnp.float32),
      b1.reshape(1, hidden).astype(jnp.float32), w2p)
    param = param_pad[:, :n_param]

    # ---- parameter split (matches torch .view) -----------------------------
    mix = param[:, :c * c]                          # (b, c*c)
    add = param[:, c * c:c * (c + 1)]               # (b, c)
    gamma = param[:, c * (c + 1):]                  # (b, c)
    mean_v = mean.astype(jnp.float32).reshape(1, c)
    istd_v = (1.0 / std.astype(jnp.float32)).reshape(1, c)   # multiply, not divide

    # ---- hot path: sublane-packed, spatially tiled transform ---------------
    r = 8
    while hw % r != 0:
        r //= 2
    s = hw // r
    tile_s = _choose_spatial_tile(s)
    xr = xf.reshape(b, c, r, s)                     # free row-major relabel

    out_r = pl.pallas_call(
        transform_kernel,
        out_shape=jax.ShapeDtypeStruct((b, c, r, s), jnp.float32),
        grid=(b, s // tile_s),
        in_specs=[
            pl.BlockSpec(memory_space=pltpu.MemorySpace.SMEM),   # mix
            pl.BlockSpec(memory_space=pltpu.MemorySpace.SMEM),   # add
            pl.BlockSpec(memory_space=pltpu.MemorySpace.SMEM),   # gamma
            pl.BlockSpec(memory_space=pltpu.MemorySpace.SMEM),   # mean
            pl.BlockSpec(memory_space=pltpu.MemorySpace.SMEM),   # inv_std
            pl.BlockSpec((1, c, r, tile_s), lambda bi, si: (bi, 0, 0, si)),
        ],
        out_specs=pl.BlockSpec((1, c, r, tile_s), lambda bi, si: (bi, 0, 0, si)),
        compiler_params=pltpu.CompilerParams(
            dimension_semantics=("parallel", "parallel")),
    )(mix, add, gamma, mean_v, istd_v, xr)

    return out_r.reshape(b, c, h, w)


# --------------------------------------------------------------------------
# Pure-JAX reference (mirrors the PyTorch forward) for verification.
# --------------------------------------------------------------------------
def reference_forward(x, w1, b1, w2, mean, std, pool_size):
    b, c, h, w = x.shape
    hb, wb = h // pool_size, w // pool_size
    pooled = x.reshape(b, c, pool_size, hb, pool_size, wb).mean(axis=(3, 5))
    feat = pooled.reshape(b, c * pool_size * pool_size)
    hid = jnp.clip(feat @ w1 + b1, 0.0, 6.0)
    p = jax.nn.sigmoid(hid @ w2)
    m = p[:, :c * c].reshape(b, c, c)
    add = p[:, c * c:c * (c + 1)].reshape(b, c, 1, 1)
    gamma = p[:, c * (c + 1):].reshape(b, c, 1, 1)
    out = jnp.einsum("bij,bjs->bis", m, x.reshape(b, c, h * w)).reshape(b, c, h, w)
    out = out + add
    out = jnp.power(out, gamma)
    out = (out - mean.reshape(1, c, 1, 1)) / std.reshape(1, c, 1, 1)
    return out


if __name__ == "__main__":
    B, C, H, W = 2, 3, 16, 16          # NCHW input (c must be 3 per module)
    POOL = 8
    HIDDEN = 32

    key = jax.random.PRNGKey(0)
    k_x, k_w1, k_b1, k_w2 = jax.random.split(key, 4)

    # image-like positive inputs so the fractional power is well defined
    x = jax.random.uniform(k_x, (B, C, H, W), jnp.float32, minval=0.05, maxval=1.0)

    in_f = C * POOL * POOL
    out_f = C * C + 2 * C
    bound1 = 1.0 / np.sqrt(in_f)
    bound2 = 1.0 / np.sqrt(HIDDEN)
    w1 = jax.random.uniform(k_w1, (in_f, HIDDEN), jnp.float32, -bound1, bound1)
    b1 = jax.random.uniform(k_b1, (HIDDEN,), jnp.float32, -bound1, bound1)
    w2 = jax.random.uniform(k_w2, (HIDDEN, out_f), jnp.float32, -bound2, bound2)

    mean = jnp.array([0.485, 0.456, 0.406], jnp.float32)
    std = jnp.array([0.229, 0.224, 0.225], jnp.float32)

    out = preprocessing_forward(x, w1, b1, w2, mean, std, POOL)
    out = jax.block_until_ready(out)

    ref = reference_forward(x, w1, b1, w2, mean, std, POOL)
    assert out.shape == (B, C, H, W)
    err = np.max(np.abs(np.asarray(out) - np.asarray(ref)))
    assert err < 2e-3, f"mismatch vs reference, max abs err = {err}"

    print("KERNEL_OK")
</pallas_src>

<mosaic_0001>
module attributes {stable_mosaic.version = 11 : i64} {
  func.func @fc_kernel(%arg0: i32, %arg1: memref<2x192xf32, #tpu.memory_space<vmem>>, %arg2: memref<192x32xf32, #tpu.memory_space<vmem>>, %arg3: memref<1x32xf32, #tpu.memory_space<vmem>>, %arg4: memref<32x128xf32, #tpu.memory_space<vmem>>, %arg5: memref<2x128xf32, #tpu.memory_space<vmem>>) attributes {dimension_semantics = [#tpu.dimension_semantics<arbitrary>], iteration_bounds = array<i64: 1>, scalar_prefetch = 0 : i64, scratch_operands = 0 : i64, tpu.core_type = #tpu.core_type<tc>, window_params = [{pipeline_mode = #tpu.pipeline_mode<synchronous>, transform_indices = @transform_0, window_bounds = array<i64: 2, 192>}, {pipeline_mode = #tpu.pipeline_mode<synchronous>, transform_indices = @transform_1, window_bounds = array<i64: 192, 32>}, {pipeline_mode = #tpu.pipeline_mode<synchronous>, transform_indices = @transform_2, window_bounds = array<i64: 1, 32>}, {pipeline_mode = #tpu.pipeline_mode<synchronous>, transform_indices = @transform_3, window_bounds = array<i64: 32, 128>}, {pipeline_mode = #tpu.pipeline_mode<synchronous>, transform_indices = @transform_4, window_bounds = array<i64: 2, 128>}]} {
    %c0 = arith.constant 0 : index
    %c0_0 = arith.constant 0 : index
    %0 = vector.load %arg1[%c0, %c0_0] : memref<2x192xf32, #tpu.memory_space<vmem>>, vector<2x192xf32>
    %c0_1 = arith.constant 0 : index
    %c0_2 = arith.constant 0 : index
    %1 = vector.load %arg2[%c0_1, %c0_2] : memref<192x32xf32, #tpu.memory_space<vmem>>, vector<192x32xf32>
    %cst = arith.constant dense<0.000000e+00> : vector<2x32xf32>
    %2 = tpu.matmul %0, %1, %cst {dimension_numbers = #tpu.dot_dimension_numbers<[1], [0], [0], [1], [0, 0, 1, 1], [], []>} : vector<2x192xf32>, vector<192x32xf32>, vector<2x32xf32> -> vector<2x32xf32>
    %c0_3 = arith.constant 0 : index
    %c0_4 = arith.constant 0 : index
    %3 = vector.load %arg3[%c0_3, %c0_4] : memref<1x32xf32, #tpu.memory_space<vmem>>, vector<1x32xf32>
    %4 = vector.broadcast %3 : vector<1x32xf32> to vector<2x32xf32>
    %5 = arith.addf %2, %4 : vector<2x32xf32>
    %cst_5 = arith.constant 0.000000e+00 : f32
    %cst_6 = arith.constant 6.000000e+00 : f32
    %6 = vector.broadcast %cst_5 : f32 to vector<2x32xf32>
    %7 = arith.maximumf %6, %5 : vector<2x32xf32>
    %8 = vector.broadcast %cst_6 : f32 to vector<2x32xf32>
    %9 = arith.minimumf %8, %7 : vector<2x32xf32>
    %c0_7 = arith.constant 0 : index
    %c0_8 = arith.constant 0 : index
    %10 = vector.load %arg4[%c0_7, %c0_8] : memref<32x128xf32, #tpu.memory_space<vmem>>, vector<32x128xf32>
    %cst_9 = arith.constant dense<0.000000e+00> : vector<2x128xf32>
    %11 = tpu.matmul %9, %10, %cst_9 {dimension_numbers = #tpu.dot_dimension_numbers<[1], [0], [0], [1], [0, 0, 1, 1], [], []>} : vector<2x32xf32>, vector<32x128xf32>, vector<2x128xf32> -> vector<2x128xf32>
    %12 = arith.negf %11 : vector<2x128xf32>
    %13 = math.exp %12 : vector<2x128xf32>
    %cst_10 = arith.constant 1.000000e+00 : f32
    %14 = vector.broadcast %cst_10 : f32 to vector<2x128xf32>
    %15 = arith.addf %14, %13 : vector<2x128xf32>
    %16 = arith.divf %14, %15 : vector<2x128xf32>
    %c0_11 = arith.constant 0 : index
    %c0_12 = arith.constant 0 : index
    %17 = vector.load %arg5[%c0_11, %c0_12] : memref<2x128xf32, #tpu.memory_space<vmem>>, vector<2x128xf32>
    tpu.vector_store %arg5[%c0_11, %c0_12], %16 {strides = array<i32>} : memref<2x128xf32, #tpu.memory_space<vmem>>, vector<2x128xf32>,
    return
  }
  func.func @transform_0(%arg0: i32) -> (i32, i32) {
    %c0_i32 = arith.constant 0 : i32
    %c0_i32_0 = arith.constant 0 : i32
    %c0_i32_1 = arith.constant 0 : i32
    return %c0_i32, %c0_i32_0 : i32, i32
  }
  func.func @transform_1(%arg0: i32) -> (i32, i32) {
    %c0_i32 = arith.constant 0 : i32
    %c0_i32_0 = arith.constant 0 : i32
    %c0_i32_1 = arith.constant 0 : i32
    return %c0_i32, %c0_i32_0 : i32, i32
  }
  func.func @transform_2(%arg0: i32) -> (i32, i32) {
    %c0_i32 = arith.constant 0 : i32
    %c0_i32_0 = arith.constant 0 : i32
    %c0_i32_1 = arith.constant 0 : i32
    return %c0_i32, %c0_i32_0 : i32, i32
  }
  func.func @transform_3(%arg0: i32) -> (i32, i32) {
    %c0_i32 = arith.constant 0 : i32
    %c0_i32_0 = arith.constant 0 : i32
    %c0_i32_1 = arith.constant 0 : i32
    return %c0_i32, %c0_i32_0 : i32, i32
  }
  func.func @transform_4(%arg0: i32) -> (i32, i32) {
    %c0_i32 = arith.constant 0 : i32
    %c0_i32_0 = arith.constant 0 : i32
    %c0_i32_1 = arith.constant 0 : i32
    return %c0_i32, %c0_i32_0 : i32, i32
  }
}

</mosaic_0001>

<bundles_post_ra>
// kernel: tpu_custom_call.1
= control target key start
LH: loop header
LB: loop body
LE: loop exit
PB: predicated region body
PF: predicated region fallthrough
CT: control target
= control target key end

     0   :  { %v284_v1 = vmov 0.0   ;;  %vm60_vm0 = vcmask 523264   ;;  %s439_s0 = inlined_call_operand.vmem [shape: f32[2,192], index: 0, kind: input, shape index: {}]   ;;  %s440_s1 = inlined_call_operand.vmem [shape: f32[192,32], index: 1, kind: input, shape index: {}]   ;;  %s441_s2 = inlined_call_operand.vmem [shape: f32[1,32], index: 2, kind: input, shape index: {}]   ;;  %s442_s3 = inlined_call_operand.vmem [shape: f32[32,128], index: 3, kind: input, shape index: {}]   ;;  %s443_s4 = inlined_call_operand.hbm [shape: f32[2,128], index: 4, kind: output, shape index: {}]  }
   0x1   :  { %v34_v0 = vld [vmem:[%s440_s1 + $0x78] sm:$0xff]  ;;  %63 = vmatprep.subr.mxu0 %v284_v1  ;;  %v33_v2 = vld [vmem:[%s440_s1 + $0x70] sm:$0xff]  ;;  %244 = vmatprep.subr.mxu1 %v284_v1  ;;  %v32_v3 = vld [vmem:[%s440_s1 + $0x68] sm:$0xff] }
   0x2   :  { %64 = vmatpush1.msra.mxu0 %v34_v0  ;;  %v31_v4 = vld [vmem:[%s440_s1 + $0x60] sm:$0xff]  ;;  %v30_v5 = vld [vmem:[%s440_s1 + $0x58] sm:$0xff]  ;;  %v29_v7 = vld [vmem:[%s440_s1 + $0x50] sm:$0xff] }
   0x3   :  { %65 = vmatprep.subr.mxu0 %v284_v1  ;;  %v335_v6 = vld.sshfl [vmem:[%s439_s0] sm:$0x33 pattern:$0x76325410] }
   0x4   :  { %66 = vmatpush1.msra.mxu0 %v33_v2  ;;  %v58_v8 = vcombine.high %v335_v6, %v335_v6 }
   0x5   :  { %67 = vmatprep.subr.mxu0 %v284_v1 }
   0x6   :  { %68 = vmatpush1.msra.mxu0 %v32_v3 }
   0x7   :  { %69 = vmatprep.subr.mxu0 %v284_v1 }
   0x8   :  { %70 = vmatpush1.msra.mxu0 %v31_v4 }
   0x9   :  { %71 = vmatprep.subr.mxu0 %v284_v1 }
   0xa   :  { %9 = vsyncpa [#allocation3], 0  ;;  %72 = vmatpush1.msra.mxu0 %v30_v5  ;;  %v28_v9 = vld [vmem:[%s440_s1 + $0x48] sm:$0xff]  ;;  %236 = vmatprep.mubr.msk.f32.mxu0 %vm60_vm0, %v58_v8  ;;  %v27_v10 = vld [vmem:[%s440_s1 + $0x40] sm:$0xff]  ;;  %vm285_vm1 = vmmov 0   ;;  %vm139_vm2 = vcmask 261120  }
   0xb   :  { %73 = vmatprep.subr.mxu0 %v284_v1  ;;  %v26_v11 = vld [vmem:[%s440_s1 + $0x38] sm:$0xff]  ;;  %v25_v12 = vld [vmem:[%s440_s1 + $0x30] sm:$0xff]  ;;  %v24_v13 = vld [vmem:[%s440_s1 + $0x28] sm:$0xff]  ;;  %252 = vmatprep.mubr.msk.f32.mxu1 %vm285_vm1, %v284_v1 }
   0xc   :  { %74 = vmatpush1.msra.mxu0 %v29_v7  ;;  %v23_v14 = vld [vmem:[%s440_s1 + $0x20] sm:$0xff]  ;;  %v22_v15 = vld [vmem:[%s440_s1 + $0x18] sm:$0xff]  ;;  %v21_v16 = vld [vmem:[%s440_s1 + $0x10] sm:$0xff] }
   0xd   :  { %75 = vmatprep.subr.mxu0 %v284_v1  ;;  %v20_v17 = vld [vmem:[%s440_s1 + $0x8] sm:$0xff]  ;;  %v19_v18 = vld [vmem:[%s440_s1] sm:$0xff]  ;;  %v42_v19 = vld [vmem:[%s440_s1 + $0xb8] sm:$0xff] }
   0xe   :  { %76 = vmatpush1.msra.mxu0 %v28_v9  ;;  %v41_v20 = vld [vmem:[%s440_s1 + $0xb0] sm:$0xff]  ;;  %v40_v21 = vld [vmem:[%s440_s1 + $0xa8] sm:$0xff]  ;;  %v39_v22 = vld [vmem:[%s440_s1 + $0xa0] sm:$0xff] }
   0xf   :  { %77 = vmatprep.subr.mxu0 %v284_v1  ;;  %v38_v23 = vld [vmem:[%s440_s1 + $0x98] sm:$0xff]  ;;  %v37_v24 = vld [vmem:[%s440_s1 + $0x90] sm:$0xff]  ;;  %v36_v25 = vld [vmem:[%s440_s1 + $0x88] sm:$0xff] }
  0x10   :  { %78 = vmatpush1.msra.mxu0 %v27_v10  ;;  %v35_v26 = vld [vmem:[%s440_s1 + $0x80] sm:$0xff]  ;;  %v138_v27 = vld [vmem:[%s442_s3 + $0x18] sm:$0xff]  ;;  %v137_v28 = vld [vmem:[%s442_s3 + $0x10] sm:$0xff] }
  0x11   :  { %79 = vmatprep.subr.mxu0 %v284_v1  ;;  %245 = vmatpush3.msra.mxu1 %v138_v27  ;;  %v136_v29 = vld [vmem:[%s442_s3 + $0x8] sm:$0xff]  ;;  %v135_v30 = vld [vmem:[%s442_s3] sm:$0xff]  ;;  %s286_s3 = smov [#allocation2]  }
  0x12   :  { %80 = vmatpush1.msra.mxu0 %v26_v11  ;;  %246 = vmatprep.subr.mxu1 %v284_v1  ;;  %v234_v31 = vld [vmem:[%s441_s2] ss:$0 sm:$0xff]  ;;  %s226_s20 = sshll.u32 %s286_s3, 4  ;;  %s227_s20 = int_to_ptr.vmem [resolvable:$true] %s226_s20 }
  0x13   :  { %81 = vmatprep.subr.mxu0 %v284_v1  ;;  %247 = vmatpush3.msra.mxu1 %v137_v28  ;;  %s262_s2 = scalar_lea.vmem %s227_s20, 32  ;;  %p267_p1 = scmp.lt.s32.totalorder %s227_s20, %s227_s20 }
  0x14   :  { %82 = vmatpush1.msra.mxu0 %v25_v12  ;;  %248 = vmatprep.subr.mxu1 %v284_v1  ;;  %p263_p0 = scmp.ne.s32.totalorder %s227_s20, %s262_s2  ;;  %p268_p2 = scmp.lt.s32.totalorder %s262_s2, %s262_s2 }
  0x15   :  { %83 = vmatprep.subr.mxu0 %v284_v1  ;;  %249 = vmatpush3.msra.mxu1 %v136_v29 }
  0x16   :  { %84 = vmatpush1.msra.mxu0 %v24_v13  ;;  %250 = vmatprep.subr.mxu1 %v284_v1  ;;  %p269_p3 = por %p268_p2, %p267_p1 }
  0x17   :  { %85 = vmatprep.subr.mxu0 %v284_v1  ;;  %251 = vmatpush3.msra.mxu1 %v135_v30 }
  0x18   :  { %86 = vmatpush1.msra.mxu0 %v23_v14  ;;  %p270_p4 = pnand %p269_p3, %p263_p0 }
  0x19   :  { %87 = vmatprep.subr.mxu0 %v284_v1 }
  0x1a   :  { %88 = vmatpush1.msra.mxu0 %v22_v15 }
  0x1b   :  { %89 = vmatprep.subr.mxu0 %v284_v1 }
  0x1c   :  { %90 = vmatpush1.msra.mxu0 %v21_v16 }
  0x1d   :  { %91 = vmatprep.subr.mxu0 %v284_v1 }
  0x1e   :  { %92 = vmatpush1.msra.mxu0 %v20_v17 }
  0x1f   :  { %93 = vmatprep.subr.mxu0 %v284_v1 }
  0x20   :  { %94 = vmatpush1.msra.mxu0 %v19_v18 }
  0x21   :  { %111 = vmatprep.subr.mxu0 %v284_v1 }
  0x22   :  { %112 = vmatpush2.msra.mxu0 %v42_v19 }
  0x23   :  { %113 = vmatprep.subr.mxu0 %v284_v1 }
  0x24   :  { %114 = vmatpush2.msra.mxu0 %v41_v20 }
  0x25   :  { %115 = vmatprep.subr.mxu0 %v284_v1 }
  0x26   :  { %116 = vmatpush2.msra.mxu0 %v40_v21 }
  0x27   :  { %117 = vmatprep.subr.mxu0 %v284_v1 }
  0x28   :  { %118 = vmatpush2.msra.mxu0 %v39_v22 }
  0x29   :  { %119 = vmatprep.subr.mxu0 %v284_v1 }
  0x2a   :  { %120 = vmatpush2.msra.mxu0 %v38_v23 }
  0x2b   :  { %121 = vmatprep.subr.mxu0 %v284_v1 }
  0x2c   :  { %122 = vmatpush2.msra.mxu0 %v37_v24 }
  0x2d   :  { %123 = vmatprep.subr.mxu0 %v284_v1 }
  0x2e   :  { %124 = vmatpush2.msra.mxu0 %v36_v25 }
  0x2f   :  { %125 = vmatprep.subr.mxu0 %v284_v1 }
  0x30   :  { %126 = vmatpush2.msra.mxu0 %v35_v26 }
  0x31   :  { %128 = vmatmul.mubr.f32.vlgmr.msra.gmra.mxu0 %v335_v6 }
  0xf1   :  { %v129_v32 = vpop.f32.mrf.mxu0 }
  0xf2   :  { %v130_v33 = vadd.f32 %v234_v31, %v129_v32 }
  0xf3   :  { %v131_v34 = vpop.f32.mrf.mxu0 }
  0xf4   :  { %v133_v35 = vmax.f32 %v130_v33, 0.0 }
  0xf6   :  { %v134_v36 = vmin.f32 %v133_v35, 6.0 }
  0xf8   :  { %253 = vmatmul.mubr.msk.f32.vlgmr.msra.gmra.mxu1 %vm139_vm2, %v134_v36 }
 0x1b8   :  { %v209_v37 = vpop.f32.mrf.mxu1 }
 0x1b9   :  { %v238_v38 = vmul.f32 -1.442695, %v209_v37 }
 0x1ba   :  { %v254_v39 = vpop.f32.mrf.mxu1 }
 0x1bb   :  { %258 = vpow2.f32 %v238_v38 }
 0x1c8   :  { %v259_v40 = vpop.eup %258 }
 0x1c9   :  { %v216_v41 = vadd.f32 1.0, %v259_v40 }
 0x1cb   :  { %260 = vrcp.f32 %v216_v41 }
 0x1d8   :  { %v261_v42 = vpop.eup %260 }
 0x1d9   :  { %219 = vst [vmem:[#allocation2] sm:$0x3] %v261_v42 }
 0x1da   :  { %273 = shalt.err (!%p270_p4)
}
 0x1db   :  { %229 = dma.vmem_to_hbm [thread:$0]  %s227_s20, 32, %s443_s4, [#allocation3]  }
 0x1dc   :  { %282 = dma.done.wait [#allocation3], 32  }
 0x1dd   :  { %283 = vsyncadd [#allocation3], 4294967264 }
 0x1de   :  { %233 = vsyncpa [#allocation3], 1 }

</bundles_post_ra>
